<compile_context>
chip_gen: v5e
topology: v5e:2x2
jax: 0.10.0
libtpu: 0.0.40
codegen_flags: <defaults>
</compile_context>

<pallas_src>
import jax
import jax.numpy as jnp
from jax.experimental import pallas as pl
from jax.experimental.pallas import tpu as pltpu

# ----------------------------- config ---------------------------------------
B = 2           # batch
S = 8           # sequence length
E = 32          # embed_dim
C = 16          # context_dim
H = 4           # num attention heads
DH = E // H     # head dim
BS = B * S      # fused batch*sequence rows
HBS = H * BS    # head-stacked rows
LN_EPS = 1e-5

# ----------------------------- packed-slab layout ----------------------------
# One f32 parameter slab; each entry starts on an 8-row boundary, lane 0.
ROW_MASK = 0                  # (HBS, HBS)  additive attention mask (0 / -1e30)
ROW_WADA = ROW_MASK + HBS     # (C, 3E)     fused adaLN shift|scale|gate weight
ROW_BADA = ROW_WADA + C       # (1, 3E)     fused adaLN bias ("+1" folded into scale)
ROW_LNG = ROW_BADA + 8        # (1, E)      norm1 gamma
ROW_LNB = ROW_LNG + 8         # (1, E)      norm1 beta
ROW_WQKV = ROW_LNB + 8        # (E, 3E)     fused Q|K|V weight (1/sqrt(DH) in Q block)
ROW_BQKV = ROW_WQKV + E       # (1, 3E)
ROW_WO = ROW_BQKV + 8         # (E, E)      output projection
ROW_BO = ROW_WO + E           # (1, E)
SLAB_ROWS = ROW_BO + 8        # = 184 (multiple of 8)
SLAB_LANES = 128


# ----------------------------- kernel ---------------------------------------
def dit_kernel(q_ref, ctx_ref, slab_ref, out_ref):
    q = q_ref[...]                                          # (BS, E)
    ctx = ctx_ref[...]                                      # (B, C)

    # --- static views into the packed parameter slab (aligned window loads) ---
    mask = slab_ref[ROW_MASK:ROW_MASK + HBS, 0:HBS]         # (HBS, HBS)
    w_ada = slab_ref[ROW_WADA:ROW_WADA + C, 0:3 * E]        # (C, 3E)
    b_ada = slab_ref[ROW_BADA:ROW_BADA + 1, 0:3 * E]        # (1, 3E)
    ln_g = slab_ref[ROW_LNG:ROW_LNG + 1, 0:E]               # (1, E)
    ln_b = slab_ref[ROW_LNB:ROW_LNB + 1, 0:E]               # (1, E)
    w_qkv = slab_ref[ROW_WQKV:ROW_WQKV + E, 0:3 * E]        # (E, 3E)
    b_qkv = slab_ref[ROW_BQKV:ROW_BQKV + 1, 0:3 * E]        # (1, 3E)
    w_o = slab_ref[ROW_WO:ROW_WO + E, 0:E]                  # (E, E)
    b_o = slab_ref[ROW_BO:ROW_BO + 1, 0:E]                  # (1, E)

    # --- adaLN modulation: SiLU(ctx), broadcast rows per batch, one fused matmul ---
    hc = ctx * jax.nn.sigmoid(ctx)                          # (B, C), SiLU on EUP
    hc_rows = jnp.concatenate(
        [jnp.broadcast_to(hc[b:b + 1, :], (S, C)) for b in range(B)], axis=0)  # (BS, C)
    mod = jnp.dot(hc_rows, w_ada,
                  preferred_element_type=jnp.float32) + b_ada                  # (BS, 3E)
    shift = mod[:, 0:E]
    scale1p = mod[:, E:2 * E]        # 1 + scale (the "+1" was folded into the bias)
    gate = mod[:, 2 * E:3 * E]

    # --- LayerNorm(q) (norm1) + modulate ---
    mu = jnp.mean(q, axis=-1, keepdims=True)
    xc = q - mu
    var = jnp.mean(xc * xc, axis=-1, keepdims=True)
    qn = xc * jax.lax.rsqrt(var + LN_EPS)
    qn = qn * ln_g + ln_b
    x = qn * scale1p + shift                                                    # (BS, E)

    # --- fused Q|K|V projection (one matmul), then head-stacked relayout ---
    qkv = jnp.dot(x, w_qkv, preferred_element_type=jnp.float32) + b_qkv         # (BS, 3E)

    def head_stack(base):
        # (BS, E) lane block -> (H*BS, DH): head h occupies rows [h*BS, (h+1)*BS)
        return jnp.concatenate(
            [qkv[:, base + h * DH: base + (h + 1) * DH] for h in range(H)], axis=0)

    qs = head_stack(0)              # (HBS, DH)  (scale already folded into weights)
    ks = head_stack(E)              # (HBS, DH)
    vs = head_stack(2 * E)          # (HBS, DH)

    # --- one attention over the (head, batch)-stacked rows ---
    scores = jax.lax.dot_general(qs, ks, (((1,), (1,)), ((), ())),
                                 preferred_element_type=jnp.float32)            # (HBS, HBS)
    scores = scores + mask          # -1e30 outside the S x S diagonal blocks
    m = jnp.max(scores, axis=-1, keepdims=True)
    e = jnp.exp(scores - m)
    ssum = jnp.sum(e, axis=-1, keepdims=True)
    p = e * pl.reciprocal(ssum, approx=False)
    hv = jnp.dot(p, vs, preferred_element_type=jnp.float32)                     # (HBS, DH)

    # --- back to (BS, E) by lane-concatenating head blocks; one output matmul ---
    attn = jnp.concatenate([hv[h * BS:(h + 1) * BS, :] for h in range(H)], axis=1)
    o = jnp.dot(attn, w_o, preferred_element_type=jnp.float32) + b_o            # (BS, E)

    # --- gated residual ---
    out_ref[...] = (q + gate * o).astype(out_ref.dtype)


# ----------------------------- param packing (one-time) ----------------------
def pack_params(ada_w, ada_b, ln1_g, ln1_b, wq, bq, wk, bk, wv, bv, wo, bo):
    """Wrapper-side constant folding + packing into one f32 slab:
    drop dead adaLN columns, fold modulate's "+1" into the scale bias, fold
    1/sqrt(DH) into the Q projection, fuse the Q/K/V weights, and bake the
    block-diagonal (head,batch) attention mask."""
    inv_sqrt_dh = float(DH) ** -0.5

    w_ada = ada_w[:, 0:3 * E]                                  # (C, 3E)
    b_ada = ada_b[:, 0:3 * E]
    b_ada = b_ada.at[:, E:2 * E].add(1.0)                      # fold modulate's "1 +"

    w_qkv = jnp.concatenate([wq * inv_sqrt_dh, wk, wv], axis=1)    # (E, 3E)
    b_qkv = jnp.concatenate([bq * inv_sqrt_dh, bk, bv], axis=1)    # (1, 3E)

    # head-stacked rows: index = h*BS + b*S + s  ->  same (head,batch) block iff
    # same (index // S); additive mask forbids cross-head / cross-batch attention.
    blk = jnp.arange(HBS) // S
    mask = jnp.where(blk[:, None] == blk[None, :],
                     jnp.float32(0.0), jnp.float32(-1e30))         # (HBS, HBS)

    slab = jnp.zeros((SLAB_ROWS, SLAB_LANES), jnp.float32)

    def put(sl, row, a):
        a = jnp.asarray(a, jnp.float32)
        return sl.at[row:row + a.shape[0], 0:a.shape[1]].set(a)

    slab = put(slab, ROW_MASK, mask)
    slab = put(slab, ROW_WADA, w_ada)
    slab = put(slab, ROW_BADA, b_ada)
    slab = put(slab, ROW_LNG, ln1_g)
    slab = put(slab, ROW_LNB, ln1_b)
    slab = put(slab, ROW_WQKV, w_qkv)
    slab = put(slab, ROW_BQKV, b_qkv)
    slab = put(slab, ROW_WO, wo)
    slab = put(slab, ROW_BO, bo)
    return slab


# ----------------------------- wrapper ---------------------------------------
@jax.jit
def dit_layer_forward(q, ctx, slab):
    q2d = q.reshape(BS, E)                  # trivial contiguous reshape
    vmem = pl.BlockSpec(memory_space=pltpu.MemorySpace.VMEM)

    out2d = pl.pallas_call(
        dit_kernel,
        out_shape=jax.ShapeDtypeStruct((BS, E), q.dtype),
        in_specs=[vmem, vmem, vmem],
        out_specs=vmem,
    )(q2d, ctx, slab)

    return out2d.reshape(B, S, E)


# ----------------------------- pure-JAX reference -----------------------------
def dit_layer_reference(q, ctx, params):
    (ada_w, ada_b, ln1_g, ln1_b,
     wq, bq, wk, bk, wv, bv, wo, bo) = params

    h = ctx * jax.nn.sigmoid(ctx)
    mod = h @ ada_w + ada_b                              # (B, 6E)
    shift_msa, scale_msa, gate_msa, _, _, _ = jnp.split(mod, 6, axis=1)

    mu = jnp.mean(q, axis=-1, keepdims=True)
    var = jnp.mean((q - mu) ** 2, axis=-1, keepdims=True)
    qn = (q - mu) / jnp.sqrt(var + LN_EPS)
    qn = qn * ln1_g + ln1_b

    x = qn * (1.0 + scale_msa[:, None, :]) + shift_msa[:, None, :]

    Q = x @ wq + bq
    K = x @ wk + bk
    V = x @ wv + bv
    Qh = Q.reshape(B, S, H, DH).transpose(0, 2, 1, 3)
    Kh = K.reshape(B, S, H, DH).transpose(0, 2, 1, 3)
    Vh = V.reshape(B, S, H, DH).transpose(0, 2, 1, 3)
    scores = jnp.einsum('bhqd,bhkd->bhqk', Qh, Kh) / jnp.sqrt(jnp.float32(DH))
    p = jax.nn.softmax(scores, axis=-1)
    attn = jnp.einsum('bhqk,bhkd->bhqd', p, Vh)
    attn = attn.transpose(0, 2, 1, 3).reshape(B, S, E)
    o = attn @ wo + bo

    return q + gate_msa[:, None, :] * o


# ----------------------------- main ------------------------------------------
if __name__ == "__main__":
    key = jax.random.PRNGKey(0)
    keys = jax.random.split(key, 16)

    q = jax.random.normal(keys[0], (B, S, E), jnp.float32)
    ctx = jax.random.normal(keys[1], (B, C), jnp.float32)

    # Deterministic synthetic parameter init (note: the PyTorch module zeroes
    # the adaLN linear at init; we use small random values so the kernel's
    # compute path is actually exercised). Weights stored (in, out).
    s = 0.1
    ada_w = s * jax.random.normal(keys[2], (C, 6 * E), jnp.float32)
    ada_b = s * jax.random.normal(keys[3], (1, 6 * E), jnp.float32)
    ln1_g = 1.0 + s * jax.random.normal(keys[4], (1, E), jnp.float32)
    ln1_b = s * jax.random.normal(keys[5], (1, E), jnp.float32)
    wq = s * jax.random.normal(keys[6], (E, E), jnp.float32)
    bq = s * jax.random.normal(keys[7], (1, E), jnp.float32)
    wk = s * jax.random.normal(keys[8], (E, E), jnp.float32)
    bk = s * jax.random.normal(keys[9], (1, E), jnp.float32)
    wv = s * jax.random.normal(keys[10], (E, E), jnp.float32)
    bv = s * jax.random.normal(keys[11], (1, E), jnp.float32)
    wo = s * jax.random.normal(keys[12], (E, E), jnp.float32)
    bo = s * jax.random.normal(keys[13], (1, E), jnp.float32)

    raw_params = (ada_w, ada_b, ln1_g, ln1_b, wq, bq, wk, bk, wv, bv, wo, bo)
    slab = pack_params(*raw_params)

    out = dit_layer_forward(q, ctx, slab)
    out = jax.block_until_ready(out)

    ref = dit_layer_reference(q, ctx, raw_params)
    assert out.shape == (B, S, E), out.shape
    assert jnp.allclose(out, ref, atol=1e-3, rtol=1e-3), (
        float(jnp.max(jnp.abs(out - ref))))

    print("KERNEL_OK")
</pallas_src>

<mosaic_0001>
module attributes {stable_mosaic.version = 11 : i64} {
  func.func @dit_kernel(%arg0: memref<16x32xf32, #tpu.memory_space<vmem>>, %arg1: memref<2x16xf32, #tpu.memory_space<vmem>>, %arg2: memref<184x128xf32, #tpu.memory_space<vmem>>, %arg3: memref<16x32xf32, #tpu.memory_space<vmem>>) attributes {dimension_semantics = [], scalar_prefetch = 0 : i64, scratch_operands = 0 : i64, tpu.core_type = #tpu.core_type<tc>} {
    %c0 = arith.constant 0 : index
    %c0_0 = arith.constant 0 : index
    %0 = vector.load %arg0[%c0, %c0_0] : memref<16x32xf32, #tpu.memory_space<vmem>>, vector<16x32xf32>
    %c0_1 = arith.constant 0 : index
    %c0_2 = arith.constant 0 : index
    %1 = vector.load %arg1[%c0_1, %c0_2] : memref<2x16xf32, #tpu.memory_space<vmem>>, vector<2x16xf32>
    %c0_3 = arith.constant 0 : index
    %c0_4 = arith.constant 0 : index
    %2 = vector.load %arg2[%c0_3, %c0_4] : memref<184x128xf32, #tpu.memory_space<vmem>>, vector<64x64xf32>
    %c64 = arith.constant 64 : index
    %c0_5 = arith.constant 0 : index
    %3 = vector.load %arg2[%c64, %c0_5] : memref<184x128xf32, #tpu.memory_space<vmem>>, vector<16x96xf32>
    %c80 = arith.constant 80 : index
    %c0_6 = arith.constant 0 : index
    %4 = vector.load %arg2[%c80, %c0_6] : memref<184x128xf32, #tpu.memory_space<vmem>>, vector<1x96xf32>
    %c88 = arith.constant 88 : index
    %c0_7 = arith.constant 0 : index
    %5 = vector.load %arg2[%c88, %c0_7] : memref<184x128xf32, #tpu.memory_space<vmem>>, vector<1x32xf32>
    %c96 = arith.constant 96 : index
    %c0_8 = arith.constant 0 : index
    %6 = vector.load %arg2[%c96, %c0_8] : memref<184x128xf32, #tpu.memory_space<vmem>>, vector<1x32xf32>
    %c104 = arith.constant 104 : index
    %c0_9 = arith.constant 0 : index
    %7 = vector.load %arg2[%c104, %c0_9] : memref<184x128xf32, #tpu.memory_space<vmem>>, vector<32x96xf32>
    %c136 = arith.constant 136 : index
    %c0_10 = arith.constant 0 : index
    %8 = vector.load %arg2[%c136, %c0_10] : memref<184x128xf32, #tpu.memory_space<vmem>>, vector<1x96xf32>
    %c144 = arith.constant 144 : index
    %c0_11 = arith.constant 0 : index
    %9 = vector.load %arg2[%c144, %c0_11] : memref<184x128xf32, #tpu.memory_space<vmem>>, vector<32x32xf32>
    %c176 = arith.constant 176 : index
    %c0_12 = arith.constant 0 : index
    %10 = vector.load %arg2[%c176, %c0_12] : memref<184x128xf32, #tpu.memory_space<vmem>>, vector<1x32xf32>
    %11 = arith.negf %1 : vector<2x16xf32>
    %12 = math.exp %11 : vector<2x16xf32>
    %cst = arith.constant 1.000000e+00 : f32
    %13 = vector.broadcast %cst : f32 to vector<2x16xf32>
    %14 = arith.addf %13, %12 : vector<2x16xf32>
    %15 = arith.divf %13, %14 : vector<2x16xf32>
    %16 = arith.mulf %1, %15 : vector<2x16xf32>
    %17 = vector.extract_strided_slice %16 {offsets = [0, 0], sizes = [1, 16], strides = [1, 1]} : vector<2x16xf32> to vector<1x16xf32>
    %18 = vector.shape_cast %17 : vector<1x16xf32> to vector<1x16xf32>
    %19 = vector.broadcast %18 : vector<1x16xf32> to vector<8x16xf32>
    %20 = vector.extract_strided_slice %16 {offsets = [1, 0], sizes = [1, 16], strides = [1, 1]} : vector<2x16xf32> to vector<1x16xf32>
    %21 = vector.shape_cast %20 : vector<1x16xf32> to vector<1x16xf32>
    %22 = vector.broadcast %21 : vector<1x16xf32> to vector<8x16xf32>
    %23 = tpu.concatenate %19, %22 in 0 : vector<8x16xf32>, vector<8x16xf32> -> vector<16x16xf32>
    %cst_13 = arith.constant dense<0.000000e+00> : vector<16x96xf32>
    %24 = tpu.matmul %23, %3, %cst_13 {dimension_numbers = #tpu.dot_dimension_numbers<[1], [0], [0], [1], [0, 0, 1, 1], [], []>} : vector<16x16xf32>, vector<16x96xf32>, vector<16x96xf32> -> vector<16x96xf32>
    %25 = vector.broadcast %4 : vector<1x96xf32> to vector<16x96xf32>
    %26 = arith.addf %24, %25 : vector<16x96xf32>
    %27 = vector.extract_strided_slice %26 {offsets = [0, 0], sizes = [16, 32], strides = [1, 1]} : vector<16x96xf32> to vector<16x32xf32>
    %28 = vector.extract_strided_slice %26 {offsets = [0, 32], sizes = [16, 32], strides = [1, 1]} : vector<16x96xf32> to vector<16x32xf32>
    %29 = vector.extract_strided_slice %26 {offsets = [0, 64], sizes = [16, 32], strides = [1, 1]} : vector<16x96xf32> to vector<16x32xf32>
    %cst_14 = arith.constant dense<0.000000e+00> : vector<16xf32>
    %30 = vector.multi_reduction <add>, %0, %cst_14 [1] : vector<16x32xf32> to vector<16xf32>
    %31 = vector.shape_cast %30 : vector<16xf32> to vector<16x1xf32>
    %cst_15 = arith.constant 3.200000e+01 : f32
    %32 = vector.broadcast %cst_15 : f32 to vector<16x1xf32>
    %33 = arith.divf %31, %32 : vector<16x1xf32>
    %34 = vector.broadcast %33 : vector<16x1xf32> to vector<16x32xf32>
    %35 = arith.subf %0, %34 : vector<16x32xf32>
    %36 = arith.mulf %35, %35 : vector<16x32xf32>
    %cst_16 = arith.constant dense<0.000000e+00> : vector<16xf32>
    %37 = vector.multi_reduction <add>, %36, %cst_16 [1] : vector<16x32xf32> to vector<16xf32>
    %38 = vector.shape_cast %37 : vector<16xf32> to vector<16x1xf32>
    %cst_17 = arith.constant 3.200000e+01 : f32
    %39 = vector.broadcast %cst_17 : f32 to vector<16x1xf32>
    %40 = arith.divf %38, %39 : vector<16x1xf32>
    %cst_18 = arith.constant 9.99999974E-6 : f32
    %41 = vector.broadcast %cst_18 : f32 to vector<16x1xf32>
    %42 = arith.addf %40, %41 : vector<16x1xf32>
    %43 = math.rsqrt %42 : vector<16x1xf32>
    %44 = vector.broadcast %43 : vector<16x1xf32> to vector<16x32xf32>
    %45 = arith.mulf %35, %44 : vector<16x32xf32>
    %46 = vector.broadcast %5 : vector<1x32xf32> to vector<16x32xf32>
    %47 = arith.mulf %45, %46 : vector<16x32xf32>
    %48 = vector.broadcast %6 : vector<1x32xf32> to vector<16x32xf32>
    %49 = arith.addf %47, %48 : vector<16x32xf32>
    %50 = arith.mulf %49, %28 : vector<16x32xf32>
    %51 = arith.addf %50, %27 : vector<16x32xf32>
    %cst_19 = arith.constant dense<0.000000e+00> : vector<16x96xf32>
    %52 = tpu.matmul %51, %7, %cst_19 {dimension_numbers = #tpu.dot_dimension_numbers<[1], [0], [0], [1], [0, 0, 1, 1], [], []>} : vector<16x32xf32>, vector<32x96xf32>, vector<16x96xf32> -> vector<16x96xf32>
    %53 = vector.broadcast %8 : vector<1x96xf32> to vector<16x96xf32>
    %54 = arith.addf %52, %53 : vector<16x96xf32>
    %55 = vector.extract_strided_slice %54 {offsets = [0, 0], sizes = [16, 8], strides = [1, 1]} : vector<16x96xf32> to vector<16x8xf32>
    %56 = vector.extract_strided_slice %54 {offsets = [0, 8], sizes = [16, 8], strides = [1, 1]} : vector<16x96xf32> to vector<16x8xf32>
    %57 = vector.extract_strided_slice %54 {offsets = [0, 16], sizes = [16, 8], strides = [1, 1]} : vector<16x96xf32> to vector<16x8xf32>
    %58 = vector.extract_strided_slice %54 {offsets = [0, 24], sizes = [16, 8], strides = [1, 1]} : vector<16x96xf32> to vector<16x8xf32>
    %59 = tpu.concatenate %55, %56, %57, %58 in 0 : vector<16x8xf32>, vector<16x8xf32>, vector<16x8xf32>, vector<16x8xf32> -> vector<64x8xf32>
    %60 = vector.extract_strided_slice %54 {offsets = [0, 32], sizes = [16, 8], strides = [1, 1]} : vector<16x96xf32> to vector<16x8xf32>
    %61 = vector.extract_strided_slice %54 {offsets = [0, 40], sizes = [16, 8], strides = [1, 1]} : vector<16x96xf32> to vector<16x8xf32>
    %62 = vector.extract_strided_slice %54 {offsets = [0, 48], sizes = [16, 8], strides = [1, 1]} : vector<16x96xf32> to vector<16x8xf32>
    %63 = vector.extract_strided_slice %54 {offsets = [0, 56], sizes = [16, 8], strides = [1, 1]} : vector<16x96xf32> to vector<16x8xf32>
    %64 = tpu.concatenate %60, %61, %62, %63 in 0 : vector<16x8xf32>, vector<16x8xf32>, vector<16x8xf32>, vector<16x8xf32> -> vector<64x8xf32>
    %65 = vector.extract_strided_slice %54 {offsets = [0, 64], sizes = [16, 8], strides = [1, 1]} : vector<16x96xf32> to vector<16x8xf32>
    %66 = vector.extract_strided_slice %54 {offsets = [0, 72], sizes = [16, 8], strides = [1, 1]} : vector<16x96xf32> to vector<16x8xf32>
    %67 = vector.extract_strided_slice %54 {offsets = [0, 80], sizes = [16, 8], strides = [1, 1]} : vector<16x96xf32> to vector<16x8xf32>
    %68 = vector.extract_strided_slice %54 {offsets = [0, 88], sizes = [16, 8], strides = [1, 1]} : vector<16x96xf32> to vector<16x8xf32>
    %69 = tpu.concatenate %65, %66, %67, %68 in 0 : vector<16x8xf32>, vector<16x8xf32>, vector<16x8xf32>, vector<16x8xf32> -> vector<64x8xf32>
    %cst_20 = arith.constant dense<0.000000e+00> : vector<64x64xf32>
    %70 = tpu.matmul %59, %64, %cst_20 {dimension_numbers = #tpu.dot_dimension_numbers<[1], [1], [0], [0], [0, 0, 1, 0], [], []>} : vector<64x8xf32>, vector<64x8xf32>, vector<64x64xf32> -> vector<64x64xf32>
    %71 = arith.addf %70, %2 : vector<64x64xf32>
    %cst_21 = arith.constant dense<0xFF800000> : vector<64xf32>
    %72 = vector.multi_reduction <maximumf>, %71, %cst_21 [1] : vector<64x64xf32> to vector<64xf32>
    %73 = vector.shape_cast %72 : vector<64xf32> to vector<64x1xf32>
    %74 = vector.broadcast %73 : vector<64x1xf32> to vector<64x64xf32>
    %75 = arith.subf %71, %74 : vector<64x64xf32>
    %76 = math.exp %75 : vector<64x64xf32>
    %cst_22 = arith.constant dense<0.000000e+00> : vector<64xf32>
    %77 = vector.multi_reduction <add>, %76, %cst_22 [1] : vector<64x64xf32> to vector<64xf32>
    %78 = vector.shape_cast %77 : vector<64xf32> to vector<64x1xf32>
    %79 = tpu.reciprocal %78 : vector<64x1xf32> -> vector<64x1xf32>
    %80 = vector.broadcast %79 : vector<64x1xf32> to vector<64x64xf32>
    %81 = arith.mulf %76, %80 : vector<64x64xf32>
    %cst_23 = arith.constant dense<0.000000e+00> : vector<64x8xf32>
    %82 = tpu.matmul %81, %69, %cst_23 {dimension_numbers = #tpu.dot_dimension_numbers<[1], [0], [0], [1], [0, 0, 1, 1], [], []>} : vector<64x64xf32>, vector<64x8xf32>, vector<64x8xf32> -> vector<64x8xf32>
    %83 = vector.extract_strided_slice %82 {offsets = [0, 0], sizes = [16, 8], strides = [1, 1]} : vector<64x8xf32> to vector<16x8xf32>
    %84 = vector.extract_strided_slice %82 {offsets = [16, 0], sizes = [16, 8], strides = [1, 1]} : vector<64x8xf32> to vector<16x8xf32>
    %85 = vector.extract_strided_slice %82 {offsets = [32, 0], sizes = [16, 8], strides = [1, 1]} : vector<64x8xf32> to vector<16x8xf32>
    %86 = vector.extract_strided_slice %82 {offsets = [48, 0], sizes = [16, 8], strides = [1, 1]} : vector<64x8xf32> to vector<16x8xf32>
    %87 = tpu.concatenate %83, %84, %85, %86 in 1 : vector<16x8xf32>, vector<16x8xf32>, vector<16x8xf32>, vector<16x8xf32> -> vector<16x32xf32>
    %cst_24 = arith.constant dense<0.000000e+00> : vector<16x32xf32>
    %88 = tpu.matmul %87, %9, %cst_24 {dimension_numbers = #tpu.dot_dimension_numbers<[1], [0], [0], [1], [0, 0, 1, 1], [], []>} : vector<16x32xf32>, vector<32x32xf32>, vector<16x32xf32> -> vector<16x32xf32>
    %89 = vector.broadcast %10 : vector<1x32xf32> to vector<16x32xf32>
    %90 = arith.addf %88, %89 : vector<16x32xf32>
    %91 = arith.mulf %29, %90 : vector<16x32xf32>
    %92 = arith.addf %0, %91 : vector<16x32xf32>
    %c0_25 = arith.constant 0 : index
    %c0_26 = arith.constant 0 : index
    %93 = vector.load %arg3[%c0_25, %c0_26] : memref<16x32xf32, #tpu.memory_space<vmem>>, vector<16x32xf32>
    tpu.vector_store %arg3[%c0_25, %c0_26], %92 {strides = array<i32>} : memref<16x32xf32, #tpu.memory_space<vmem>>, vector<16x32xf32>,
    return
  }
}

</mosaic_0001>

<bundles_post_ra>
// kernel: dit_layer_forward.1
= control target key start
LH: loop header
LB: loop body
LE: loop exit
PB: predicated region body
PF: predicated region fallthrough
CT: control target
= control target key end

     0   :  { %8 = vsyncpa [#allocation3], 0  ;;  %s1215_s0 = inlined_call_operand.hbm [shape: f32[16,32], index: 0, kind: input, shape index: {}]   ;;  %s1216_s1 = inlined_call_operand.hbm [shape: f32[2,16], index: 1, kind: input, shape index: {}]   ;;  %s1217_s2 = inlined_call_operand.hbm [shape: f32[184,128], index: 2, kind: input, shape index: {}]   ;;  %s1218_s3 = inlined_call_operand.hbm [shape: f32[16,32], index: 3, kind: output, shape index: {}]  }
   0x1   :  { %9 = vsyncpa [#allocation6], 0  ;;  %s29_s14 = sshll.u32 %s1216_s1, 4  ;;  %s30_s14 = int_to_ptr.hbm [resolvable:$true] %s29_s14 }
   0x2   :  { %10 = vsyncpa [#allocation4], 0  ;;  %s959_s15 = smov [#allocation5]   ;;  %s15_s19 = sshll.u32 %s1215_s0, 4  ;;  %s16_s19 = int_to_ptr.hbm [resolvable:$true] %s15_s19 }
   0x3   :  { %s31_s16 = sshll.u32 %s959_s15, 4  ;;  %s960_s20 = smov [#allocation2]   ;;  %s32_s16 = int_to_ptr.vmem [resolvable:$true] %s31_s16 }
   0x4   :  { %34 = dma.hbm_to_vmem [thread:$0]  %s30_s14, 32, %s32_s16, [#allocation6]  }
   0x5   :  { %s17_s21 = sshll.u32 %s960_s20, 4  ;;  %s961_s22 = smov 128   ;;  %s18_s21 = int_to_ptr.vmem [resolvable:$true] %s17_s21 }
   0x6   :  { %s962_s23 = smov 8   ;;  %s39_s25 = sshll.u32 %s1217_s2, 4  ;;  %s40_s25 = int_to_ptr.hbm [resolvable:$true] %s39_s25 }
   0x7   :  { %23 = dma.hbm_to_vmem [thread:$0]  %s16_s19, 256, %s18_s21, [#allocation3], %s961_s22, %s961_s22, %s962_s23  }
   0x8   :  { %s963_s26 = smov [#allocation7]  }
   0x9   :  { %s41_s27 = sshll.u32 %s963_s26, 4  ;;  %s42_s27 = int_to_ptr.vmem [resolvable:$true] %s41_s27 }
   0xa   :  { %47 = dma.hbm_to_vmem [thread:$0]  %s40_s25, 2944, %s42_s27, [#allocation6], %s961_s22, %s961_s22, %s962_s23  }
   0xb   :  { %953 = dma.done.wait [#allocation3], 256  }
   0xc   :  { %954 = vsyncadd [#allocation3], 4294967040 }
   0xd   :  { %955 = dma.done.wait [#allocation6], 2976  }
   0xe   :  { %956 = vsyncadd [#allocation6], 4294964320  ;;  %vm139_vm0 = vcmask 261120   ;;  %v60_v0 = vld [vmem:[#allocation2] sm:$0xff]  ;;  %v71_v3 = vld [vmem:[#allocation7 + $0x40] sm:$0xff]  ;;  %vm109_vm5 = vcmask 130048  }
   0xf   :  { %v72_v1 = vld [vmem:[#allocation7 + $0x48] sm:$0xff]  ;;  %v140_v2 = vsel %vm139_vm0, %v60_v0, 0.0  ;;  %v62_v4 = vld [vmem:[#allocation5] sm:$0x3]  ;;  %v1009_v6 = vld [vmem:[#allocation2 + $0x8] sm:$0xff]  ;;  %v964_v23 = vmov 32.0  }
  0x10   :  { %130 = vmatpush.msra.mxu0 %v72_v1  ;;  %141 = vadd.xlane.f32.xlu0 %v140_v2  ;;  %v728_v5 = vmul.f32 -1.442695, %v62_v4  ;;  %v143_v7 = vsel %vm139_vm0, %v1009_v6, 0.0  ;;  %v809_v40 = vld [vmem:[#allocation7 + $0x50] ss:$0 sm:$0xff]  ;;  %s965_s0 = smov 96  }
  0x11   :  { %v79_v45 = vld [vmem:[#allocation7 + $0x80] sm:$0xff]  ;;  %v78_v46 = vld [vmem:[#allocation7 + $0x78] sm:$0xff]  ;;  %v77_v47 = vld [vmem:[#allocation7 + $0x70] sm:$0xff]  ;;  %s966_s2 = smov 112   ;;  %s967_s28 = smov 104   ;;  %vm269_vm13 = vcmask 64512  }
  0x12   :  { %131 = vmatpush.msra.mxu0 %v71_v3  ;;  %814 = vpow2.f32 %v728_v5  ;;  %v76_v48 = vld [vmem:[#allocation7 + $0x68] sm:$0xff]  ;;  %v810_v63 = vld [vmem:[#allocation7 + $0x58] ss:$0 sm:$0xff]  ;;  %v811_v2 = vld [vmem:[#allocation7 + $0x60] ss:$0 sm:$0xff]  ;;  %s968_s29 = smov 120  }
  0x13   :  { %vm343_vm14 = vcmask 523264   ;;  %s969_s30 = smov 64   ;;  %s970_s4 = smov 16  }
  0x14   :  { %228 = vmatpush.msrb.mxu0 %v79_v45  ;;  %s971_s5 = smov 24   ;;  %s972_s6 = smov [#allocation8]  }
  0x15   :  { %s712_s7 = sshll.u32 %s972_s6, 4  ;;  %s714_s10 = sshll.u32 %s1218_s3, 4  ;;  %s713_s7 = int_to_ptr.vmem [resolvable:$true] %s712_s7  ;;  %s715_s10 = int_to_ptr.hbm [resolvable:$true] %s714_s10 }
  0x16   :  { %229 = vmatpush.msrb.mxu0 %v78_v46 }
  0x18   :  { %v815_v8 = vpop.eup %814  ;;  %144 = vadd.xlane.f32.xlu0 %v143_v7  ;;  %230 = vmatpush.msrb.mxu0 %v77_v47  ;;  %v68_v47 = vld [vmem:[#allocation7 + $0x28] sm:$0xff] }
  0x19   :  { %v89_v9 = vadd.f32 1.0, %v815_v8 }
  0x1a   :  { %231 = vmatpush.msrb.mxu0 %v76_v48 }
  0x1b   :  { %816 = vrcp.f32 %v89_v9  ;;  %v101_v12 = vand.u32 2147483648, %v89_v9  ;;  %vm95_vm1 = vweird.f32 %v89_v9  ;;  %v99_v14 = vand.u32 2147483647, %v89_v9 }
  0x1c   :  { %818 = vrcp.f32 %v964_v23 }
  0x1d   :  { %v102_v16 = vor.u32 1.1754944e-38, %v101_v12  ;;  %vm100_vm4 = vcmp.eq.f32.partialorder %v99_v14, 8.507059e+37 }
  0x21   :  { %v817_v10 = vpop.eup %816 }
  0x22   :  { %v91_v11 = vmul.f32 %v817_v10, %v89_v9  ;;  %vm96_vm2 = vweird.f32 %v817_v10  ;;  %v819_v24 = vpop.eup %818 }
  0x23   :  { %vm97_vm3 = vmor %vm95_vm1, %vm96_vm2  ;;  %v147_v25 = vmul.f32 32.0, %v819_v24  ;;  %vm151_vm6 = vweird.f32 %v819_v24 }
  0x24   :  { %v92_v13 = vsub.f32 1.0, %v91_v11 }
  0x25   :  { %v148_v26 = vsub.f32 1.0, %v147_v25 }
  0x26   :  { %v93_v15 = vmul.f32 %v817_v10, %v92_v13 }
  0x27   :  { %v149_v27 = vmul.f32 %v819_v24, %v148_v26 }
  0x28   :  { %v94_v17 = vadd.f32 %v817_v10, %v93_v15 }
  0x29   :  { %v150_v28 = vadd.f32 %v819_v24, %v149_v27 }
  0x2a   :  { %v98_v18 = vsel %vm97_vm3, %v817_v10, %v94_v17 }
  0x2b   :  { %v103_v19 = vsel %vm100_vm4, %v102_v16, %v98_v18  ;;  %v152_v29 = vsel %vm151_vm6, %v819_v24, %v150_v28 }
  0x2c   :  { %v105_v20 = vmul.f32 %v103_v19, %v62_v4 }
  0x2e   :  { %v106_v21 = vperm.slane %v105_v20, 0  ;;  %v107_v22 = vperm.slane %v105_v20, 1  ;;  %v812_v20 = vld [vmem:[#allocation7 + $0x88] ss:$0 sm:$0xff] }
  0x30   :  { %729 = vmatmul.msk.f32.vlgmr.msra.gmra.mxu0 %vm109_vm5, %v106_v21 }
  0x38   :  { %730 = vmatmul.msk.f32.gmra.mxu0 %vm109_vm5, %v107_v22 }
  0x83   :  { %v142_v30 = vpop.xlane.xlu0 %141 }
  0x84   :  { %v153_v31 = vmul.f32 %v152_v29, %v142_v30 }
  0x86   :  { %v155_v32 = vsub.f32 %v60_v0, %v153_v31 }
  0x88   :  { %v157_v33 = vmul.f32 %v155_v32, %v155_v32 }
  0x8a   :  { %v159_v34 = vsel %vm139_vm0, %v157_v33, 0.0 }
  0x8b   :  { %160 = vadd.xlane.f32.xlu1 %v159_v34  ;;  %v145_v35 = vpop.xlane.xlu0 %144 }
  0x8c   :  { %v154_v36 = vmul.f32 %v152_v29, %v145_v35 }
  0x8e   :  { %v156_v37 = vsub.f32 %v1009_v6, %v154_v36 }
  0x90   :  { %v158_v38 = vmul.f32 %v156_v37, %v156_v37 }
  0x92   :  { %v162_v39 = vsel %vm139_vm0, %v158_v38, 0.0 }
  0x93   :  { %163 = vadd.xlane.f32.xlu1 %v162_v39 }
  0xad   :  { %v133_v41 = vpop.f32.mrf.mxu0 }
  0xae   :  { %v1018_v42 = vadd.f32 %v809_v40, %v133_v41 }
  0xb0   :  { %199 = vrot.lane.b32.xlu2 %v1018_v42, %s965_s0 }
  0xb5   :  { %v136_v43 = vpop.f32.mrf.mxu0 }
  0xb6   :  { %v1022_v44 = vadd.f32 %v809_v40, %v136_v43  ;;  %v67_v40 = vld [vmem:[#allocation7 + $0x20] sm:$0xff] }
  0xb8   :  { %201 = vrot.lane.b32.xlu2 %v1022_v44, %s965_s0 }
  0xfe   :  { %v161_v49 = vpop.xlane.xlu1 %160 }
  0xff   :  { %v165_v50 = vmul.f32 %v161_v49, %v152_v29 }
 0x101   :  { %v167_v51 = vadd.f32 1e-05, %v165_v50 }
 0x103   :  { %820 = vrsqrt.f32 %v167_v51  ;;  %vm175_vm8 = vweird.f32 %v167_v51 }
 0x106   :  { %v164_v52 = vpop.xlane.xlu1 %163 }
 0x107   :  { %v166_v53 = vmul.f32 %v164_v52, %v152_v29  ;;  %v65_v52 = vld [vmem:[#allocation7 + $0x10] sm:$0xff] }
 0x109   :  { %v821_v54 = vpop.eup %820  ;;  %v168_v55 = vadd.f32 1e-05, %v166_v53  ;;  %v69_v53 = vld [vmem:[#allocation7 + $0x30] sm:$0xff] }
 0x10a   :  { %v170_v56 = vmul.f32 %v821_v54, %v167_v51  ;;  %vm176_vm7 = vweird.f32 %v821_v54  ;;  %v200_v5 = vpop.permute.xlu2 %199 }
 0x10b   :  { %822 = vrsqrt.f32 %v168_v55  ;;  %vm177_vm9 = vmor %vm175_vm8, %vm176_vm7  ;;  %vm185_vm11 = vweird.f32 %v168_v55 }
 0x10c   :  { %v171_v57 = vmul.f32 %v821_v54, %v170_v56 }
 0x10e   :  { %v172_v58 = vmul.f32 0.5, %v171_v57 }
 0x110   :  { %v173_v59 = vsub.f32 1.5, %v172_v58 }
 0x111   :  { %v823_v60 = vpop.eup %822 }
 0x112   :  { %v174_v61 = vmul.f32 %v821_v54, %v173_v59  ;;  %v180_v62 = vmul.f32 %v823_v60, %v168_v55  ;;  %vm186_vm10 = vweird.f32 %v823_v60  ;;  %v202_v16 = vpop.permute.xlu2 %201  ;;  %v66_v59 = vld [vmem:[#allocation7 + $0x18] sm:$0xff] }
 0x113   :  { %vm187_vm12 = vmor %vm185_vm11, %vm186_vm10 }
 0x114   :  { %v181_v0 = vmul.f32 %v823_v60, %v180_v62  ;;  %v178_v1 = vsel %vm177_vm9, %v821_v54, %v174_v61  ;;  %v70_v61 = vld [vmem:[#allocation7 + $0x38] sm:$0xff] }
 0x115   :  { %v189_v3 = vmul.f32 %v178_v1, %v155_v32 }
 0x116   :  { %v182_v4 = vmul.f32 0.5, %v181_v0 }
 0x117   :  { %v192_v7 = vmul.f32 %v810_v63, %v189_v3 }
 0x118   :  { %v183_v8 = vsub.f32 1.5, %v182_v4 }
 0x119   :  { %v195_v9 = vadd.f32 %v811_v2, %v192_v7 }
 0x11a   :  { %v184_v10 = vmul.f32 %v823_v60, %v183_v8 }
 0x11b   :  { %v205_v11 = vmul.f32 %v200_v5, %v195_v9 }
 0x11c   :  { %v188_v12 = vsel %vm187_vm12, %v823_v60, %v184_v10 }
 0x11d   :  { %v207_v13 = vadd.f32 %v205_v11, %v1018_v42  ;;  %v190_v14 = vmul.f32 %v188_v12, %v156_v37  ;;  %v64_v12 = vld [vmem:[#allocation7 + $0x8] sm:$0xff] }
 0x11f   :  { %731 = vmatmul.msk.f32.vlgmr.msrb.gmra.mxu0 %vm139_vm0, %v207_v13  ;;  %v193_v15 = vmul.f32 %v810_v63, %v190_v14 }
 0x121   :  { %v196_v17 = vadd.f32 %v811_v2, %v193_v15 }
 0x123   :  { %v206_v18 = vmul.f32 %v202_v16, %v196_v17 }
 0x125   :  { %v208_v19 = vadd.f32 %v206_v18, %v1022_v44 }
 0x127   :  { %732 = vmatmul.msk.f32.gmra.mxu0 %vm139_vm0, %v208_v19 }
 0x19c   :  { %v233_v21 = vpop.f32.mrf.mxu0 }
 0x19d   :  { %v1030_v22 = vadd.f32 %v812_v20, %v233_v21 }
 0x19f   :  { %245 = vrot.lane.b32.xlu2 %v1030_v22, %s966_s2  ;;  %249 = vrot.lane.b32.xlu1 %v1030_v22, %s967_s28 }
 0x1a4   :  { %v236_v23 = vpop.f32.mrf.mxu0 }
 0x1a5   :  { %v1034_v24 = vadd.f32 %v812_v20, %v236_v23 }
 0x1a7   :  { %247 = vrot.lane.b32.xlu2 %v1034_v24, %s966_s2  ;;  %251 = vrot.lane.b32.xlu0 %v1034_v24, %s967_s28 }
 0x1af   :  { %243 = vrot.lane.b32.xlu2 %v1034_v24, %s968_s29  ;;  %241 = vrot.lane.b32.xlu0 %v1030_v22, %s968_s29 }
 0x1f9   :  { %v1040_v25 = vpop.permute.xlu2 %245 }
 0x201   :  { %v1042_v26 = vpop.permute.xlu2 %247 }
 0x202   :  { %263 = vrot.lane.b32.xlu0 %v1042_v26, %s965_s0  ;;  %v794_v3 = vpack.i.bf16 %v1040_v25, %v1042_v26 }
 0x209   :  { %v1050_v28 = vpop.permute.xlu2 %243 }
 0x211   :  { %v1046_v27 = vpop.permute.xlu1 %249 }
 0x212   :  { %265 = vrot.lane.b32.xlu1 %v1046_v27, %s965_s0 }
 0x219   :  { %v1052_v29 = vpop.permute.xlu0 %251 }
 0x21a   :  { %267 = vrot.lane.b32.xlu2 %v1052_v29, %s965_s0  ;;  %259 = vrot.lane.b32.xlu1 %v1050_v28, %s965_s0  ;;  %v789_v4 = vpack.i.bf16 %v1046_v27, %v1052_v29 }
 0x221   :  { %v1058_v30 = vpop.permute.xlu0 %241 }
 0x222   :  { %261 = vrot.lane.b32.xlu2 %v1040_v25, %s965_s0  ;;  %257 = vrot.lane.b32.xlu0 %v1058_v30, %s965_s0 }
 0x223   :  { %253 = vrot.lane.b32.xlu1 %v1030_v22, %s965_s0 }
 0x22a   :  { %255 = vrot.lane.b32.xlu2 %v1034_v24, %s965_s0 }
 0x274   :  { %v268_v31 = vpop.permute.xlu2 %267  ;;  %v264_v33 = vpop.permute.xlu0 %263 }
 0x275   :  { %733 = vmatpush.xpose.msk.msra.mxu1 %vm269_vm13, %v268_v31  ;;  %759 = vmatpush.xpose.msk.msra.mxu2 %vm269_vm13, %v268_v31 }
 0x27c   :  { %v262_v34 = vpop.permute.xlu2 %261 }
 0x284   :  { %v266_v32 = vpop.permute.xlu1 %265  ;;  %v256_v37 = vpop.permute.xlu2 %255 }
 0x285   :  { %734 = vmatpush.xpose.msk.msra.mxu1 %vm269_vm13, %v266_v32  ;;  %760 = vmatpush.xpose.msk.msra.mxu2 %vm269_vm13, %v266_v32 }
 0x289   :  { %735 = vmatpush.xpose.msk.msra.mxu1 %vm269_vm13, %v264_v33  ;;  %761 = vmatpush.xpose.msk.msra.mxu2 %vm269_vm13, %v264_v33 }
 0x28c   :  { %v260_v35 = vpop.permute.xlu1 %259 }
 0x28d   :  { %736 = vmatpush.xpose.msk.msra.mxu1 %vm269_vm13, %v262_v34  ;;  %762 = vmatpush.xpose.msk.msra.mxu2 %vm269_vm13, %v262_v34 }
 0x291   :  { %737 = vmatpush.xpose.msk.msra.mxu1 %vm269_vm13, %v260_v35  ;;  %763 = vmatpush.xpose.msk.msra.mxu2 %vm269_vm13, %v260_v35 }
 0x294   :  { %v258_v36 = vpop.permute.xlu0 %257 }
 0x295   :  { %738 = vmatpush.xpose.msk.msra.mxu1 %vm269_vm13, %v258_v36  ;;  %764 = vmatpush.xpose.msk.msra.mxu2 %vm269_vm13, %v258_v36  ;;  %v254_v38 = vpop.permute.xlu1 %253 }
 0x299   :  { %739 = vmatpush.xpose.msk.msra.mxu1 %vm269_vm13, %v256_v37  ;;  %765 = vmatpush.xpose.msk.msra.mxu2 %vm269_vm13, %v256_v37 }
 0x29d   :  { %740 = vmatpush.xpose.msk.msra.mxu1 %vm269_vm13, %v254_v38  ;;  %766 = vmatpush.xpose.msk.msra.mxu2 %vm269_vm13, %v254_v38 }
 0x2a0   :  { %741 = vmatmul.msk.f32.vlgmr.msra.gmra.mxu1 %vm269_vm13, %v1030_v22  ;;  %745 = vmatmul.msk.f32.vlgmr.msra.gmra.mxu2 %vm269_vm13, %v1040_v25 }
 0x2a8   :  { %742 = vmatmul.msk.f32.gmra.mxu1 %vm269_vm13, %v1034_v24  ;;  %746 = vmatmul.msk.f32.gmra.mxu2 %vm269_vm13, %v1042_v26 }
 0x2b0   :  { %743 = vmatmul.msk.f32.gmra.mxu1 %vm269_vm13, %v1058_v30  ;;  %747 = vmatmul.msk.f32.gmra.mxu2 %vm269_vm13, %v1046_v27 }
 0x2b8   :  { %744 = vmatmul.msk.f32.gmra.mxu1 %vm269_vm13, %v1050_v28  ;;  %748 = vmatmul.msk.f32.gmra.mxu2 %vm269_vm13, %v1052_v29 }
 0x31d   :  { %v1100_v39 = vpop.f32.mrf.mxu1 }
 0x323   :  { %v331_v41 = vpop.f32.mrf.mxu2 }
 0x324   :  { %v332_v43 = vadd.f32 %v331_v41, %v67_v40  ;;  %v804_v41 = vpack.i.bf16 %v1030_v22, %v1034_v24 }
 0x325   :  { %v322_v45 = vpop.f32.mrf.mxu1 }
 0x326   :  { %v356_v46 = vsel %vm343_vm14, %v332_v43, -inf  ;;  %v323_v13 = vadd.f32 %v322_v45, %v64_v12 }
 0x327   :  { %357 = vmax.xlane.f32.xlu1 %v356_v46 }
 0x328   :  { %v347_v20 = vsel %vm343_vm14, %v323_v13, -inf }
 0x32b   :  { %v334_v48 = vpop.f32.mrf.mxu2 }
 0x32c   :  { %v1103_v49 = vadd.f32 %v334_v48, %v68_v47  ;;  %v63_v47 = vld [vmem:[#allocation7] sm:$0xff] }
 0x32d   :  { %v325_v50 = vpop.f32.mrf.mxu1 }
 0x32e   :  { %v359_v51 = vsel %vm343_vm14, %v1103_v49, -inf  ;;  %v326_v54 = vadd.f32 %v325_v50, %v65_v52  ;;  %v1145_v50 = vadd.f32 %v1100_v39, %v63_v47 }
 0x32f   :  { %360 = vmax.xlane.f32.xlu0 %v359_v51 }
 0x330   :  { %v350_v58 = vsel %vm343_vm14, %v326_v54, -inf  ;;  %v344_v22 = vsel %vm343_vm14, %v1145_v50, -inf }
 0x333   :  { %v337_v55 = vpop.f32.mrf.mxu2 }
 0x334   :  { %v338_v56 = vadd.f32 %v337_v55, %v69_v53 }
 0x335   :  { %v328_v60 = vpop.f32.mrf.mxu1 }
 0x336   :  { %v362_v57 = vsel %vm343_vm14, %v338_v56, -inf  ;;  %v329_v62 = vadd.f32 %v328_v60, %v66_v59 }
 0x337   :  { %363 = vmax.xlane.f32.xlu2 %v362_v57  ;;  %351 = vmax.xlane.f32.xlu0 %v350_v58 }
 0x338   :  { %v353_v2 = vsel %vm343_vm14, %v329_v62, -inf }
 0x33b   :  { %v340_v63 = vpop.f32.mrf.mxu2 }
 0x33c   :  { %v1109_v0 = vadd.f32 %v340_v63, %v70_v61 }
 0x33e   :  { %v365_v1 = vsel %vm343_vm14, %v1109_v0, -inf }
 0x33f   :  { %366 = vmax.xlane.f32.xlu1 %v365_v1  ;;  %354 = vmax.xlane.f32.xlu2 %v353_v2 }
 0x34b   :  { %795 = vrot.lane.b32.xlu0 %v794_v3, %s969_s30 }
 0x357   :  { %790 = vrot.lane.b32.xlu2 %v789_v4, %s969_s30 }
 0x39a   :  { %v358_v5 = vpop.xlane.xlu1 %357 }
 0x39b   :  { %v372_v7 = vsub.f32 %v332_v43, %v358_v5  ;;  %v799_v43 = vpack.i.bf16 %v1058_v30, %v1050_v28 }
 0x39d   :  { %v384_v8 = vmul.f32 1.442695, %v372_v7 }
 0x39f   :  { %824 = vpow2.f32 %v384_v8 }
 0x3a2   :  { %v361_v9 = vpop.xlane.xlu0 %360 }
 0x3a3   :  { %v373_v51 = vsub.f32 %v1103_v49, %v361_v9 }
 0x3a5   :  { %v1120_v10 = vpop.eup %824  ;;  %v386_v52 = vmul.f32 1.442695, %v373_v51 }
 0x3a6   :  { %v404_v11 = vsel %vm343_vm14, %v1120_v10, 0.0 }
 0x3a7   :  { %405 = vadd.xlane.f32.xlu2 %v404_v11 }
 0x3aa   :  { %v364_v14 = vpop.xlane.xlu2 %363  ;;  %v352_v15 = vpop.xlane.xlu0 %351 }
 0x3ab   :  { %v374_v16 = vsub.f32 %v338_v56, %v364_v14  ;;  %v370_v17 = vsub.f32 %v326_v54, %v352_v15 }
 0x3ad   :  { %v388_v18 = vmul.f32 1.442695, %v374_v16  ;;  %v380_v19 = vmul.f32 1.442695, %v370_v17 }
 0x3af   :  { %826 = vpow2.f32 %v388_v18  ;;  %348 = vmax.xlane.f32.xlu2 %v347_v20 }
 0x3b0   :  { %828 = vpow2.f32 %v380_v19 }
 0x3b2   :  { %v355_v21 = vpop.xlane.xlu2 %354  ;;  %v367_v45 = vpop.xlane.xlu1 %366 }
 0x3b3   :  { %v371_v23 = vsub.f32 %v329_v62, %v355_v21  ;;  %v375_v46 = vsub.f32 %v1109_v0, %v367_v45 }
 0x3b5   :  { %v1125_v25 = vpop.eup %826  ;;  %v382_v26 = vmul.f32 1.442695, %v371_v23  ;;  %v390_v48 = vmul.f32 1.442695, %v375_v46 }
 0x3b6   :  { %v1127_v27 = vpop.eup %828  ;;  %v410_v29 = vsel %vm343_vm14, %v1125_v25, 0.0 }
 0x3b7   :  { %v398_v31 = vsel %vm343_vm14, %v1127_v27, 0.0  ;;  %411 = vadd.xlane.f32.xlu2 %v410_v29  ;;  %830 = vpow2.f32 %v382_v26 }
 0x3b8   :  { %399 = vadd.xlane.f32.xlu0 %v398_v31  ;;  %832 = vpow2.f32 %v390_v48 }
 0x3b9   :  { %834 = vpow2.f32 %v386_v52 }
 0x3ba   :  { %v791_v32 = vpop.permute.xlu2 %790 }
 0x3bb   :  { %v792_v33 = vunpack.i.l.bf16 %v791_v32  ;;  %v793_v34 = vunpack.i.h.bf16 %v791_v32 }
 0x3bd   :  { %592 = vmatpush.msra.mxu0 %v792_v33  ;;  %767 = vmatpush.msra.mxu3 %v792_v33  ;;  %v796_v35 = vpop.permute.xlu0 %795  ;;  %v1133_v36 = vpop.eup %830 }
 0x3be   :  { %v797_v37 = vunpack.i.l.bf16 %v796_v35  ;;  %v401_v38 = vsel %vm343_vm14, %v1133_v36, 0.0  ;;  %v798_v40 = vunpack.i.h.bf16 %v796_v35  ;;  %v1150_v24 = vpop.eup %832 }
 0x3bf   :  { %593 = vmatpush.msra.mxu0 %v793_v34  ;;  %768 = vmatpush.msra.mxu3 %v793_v34  ;;  %v413_v28 = vsel %vm343_vm14, %v1150_v24, 0.0  ;;  %v1154_v30 = vpop.eup %834 }
 0x3c0   :  { %402 = vadd.xlane.f32.xlu1 %v401_v38  ;;  %v407_v39 = vsel %vm343_vm14, %v1154_v30, 0.0 }
 0x3c1   :  { %594 = vmatpush.msra.mxu0 %v797_v37  ;;  %769 = vmatpush.msra.mxu3 %v797_v37 }
 0x3c3   :  { %595 = vmatpush.msra.mxu0 %v798_v40  ;;  %770 = vmatpush.msra.mxu3 %v798_v40 }
 0x3cc   :  { %805 = vrot.lane.b32.xlu0 %v804_v41, %s969_s30 }
 0x3d9   :  { %800 = vrot.lane.b32.xlu1 %v799_v43, %s969_s30 }
 0x3f6   :  { %345 = vmax.xlane.f32.xlu0 %v344_v22 }
 0x3fe   :  { %414 = vadd.xlane.f32.xlu0 %v413_v28 }
 0x403   :  { %408 = vadd.xlane.f32.xlu1 %v407_v39 }
 0x41a   :  { %v1158_v49 = vpop.xlane.xlu2 %405 }
 0x41b   :  { %v483_v37 = vand.u32 2147483648, %v1158_v49  ;;  %vm477_vm10 = vweird.f32 %v1158_v49 }
 0x41d   :  { %v484_v41 = vor.u32 1.1754944e-38, %v483_v37 }
 0x422   :  { %v349_v53 = vpop.xlane.xlu2 %348 }
 0x423   :  { %v369_v54 = vsub.f32 %v323_v13, %v349_v53 }
 0x425   :  { %v378_v55 = vmul.f32 1.442695, %v369_v54 }
 0x427   :  { %836 = vpow2.f32 %v378_v55 }
 0x42a   :  { %v412_v51 = vpop.xlane.xlu2 %411 }
 0x42b   :  { %v400_v58 = vpop.xlane.xlu0 %399 }
 0x42c   :  { %838 = vrcp.f32 %v400_v58  ;;  %v455_v5 = vand.u32 2147483648, %v400_v58  ;;  %vm449_vm1 = vweird.f32 %v400_v58  ;;  %v453_v8 = vand.u32 2147483647, %v400_v58 }
 0x42d   :  { %v1160_v56 = vpop.eup %836 }
 0x42e   :  { %v395_v57 = vsel %vm343_vm14, %v1160_v56, 0.0  ;;  %v456_v15 = vor.u32 1.1754944e-38, %v455_v5  ;;  %vm454_vm3 = vcmp.eq.f32.partialorder %v453_v8, 8.507059e+37 }
 0x42f   :  { %396 = vadd.xlane.f32.xlu2 %v395_v57 }
 0x432   :  { %v839_v60 = vpop.eup %838 }
 0x433   :  { %v403_v59 = vpop.xlane.xlu1 %402  ;;  %v445_v61 = vmul.f32 %v839_v60, %v400_v58  ;;  %vm450_vm15 = vweird.f32 %v839_v60 }
 0x434   :  { %840 = vrcp.f32 %v403_v59  ;;  %vm451_vm2 = vmor %vm449_vm1, %vm450_vm15  ;;  %v469_v21 = vand.u32 2147483648, %v403_v59  ;;  %vm463_vm6 = vweird.f32 %v403_v59  ;;  %v467_v29 = vand.u32 2147483647, %v403_v59 }
 0x435   :  { %v446_v62 = vsub.f32 1.0, %v445_v61  ;;  %842 = vrcp.f32 %v1158_v49 }
 0x436   :  { %v470_v33 = vor.u32 1.1754944e-38, %v469_v21  ;;  %vm468_vm8 = vcmp.eq.f32.partialorder %v467_v29, 8.507059e+37 }
 0x437   :  { %v447_v0 = vmul.f32 %v839_v60, %v446_v62 }
 0x439   :  { %v448_v3 = vadd.f32 %v839_v60, %v447_v0 }
 0x43a   :  { %v841_v63 = vpop.eup %840 }
 0x43b   :  { %v459_v1 = vmul.f32 %v841_v63, %v403_v59  ;;  %v843_v4 = vpop.eup %842  ;;  %v452_v14 = vsel %vm451_vm2, %v839_v60, %v448_v3  ;;  %vm464_vm4 = vweird.f32 %v841_v63  ;;  %v511_v3 = vand.u32 2147483648, %v412_v51 }
 0x43c   :  { %v473_v11 = vmul.f32 %v843_v4, %v1158_v49  ;;  %v457_v18 = vsel %vm454_vm3, %v456_v15, %v452_v14  ;;  %vm465_vm7 = vmor %vm463_vm6, %vm464_vm4  ;;  %vm478_vm9 = vweird.f32 %v843_v4  ;;  %vm505_vm6 = vweird.f32 %v412_v51 }
 0x43d   :  { %v460_v2 = vsub.f32 1.0, %v459_v1  ;;  %v530_v26 = vmul.f32 %v1127_v27, %v457_v18  ;;  %v481_v27 = vand.u32 2147483647, %v1158_v49  ;;  %vm479_vm11 = vmor %vm477_vm10, %vm478_vm9 }
 0x43e   :  { %v806_v13 = vpop.permute.xlu0 %805  ;;  %v474_v19 = vsub.f32 1.0, %v473_v11  ;;  %v512_v11 = vor.u32 1.1754944e-38, %v511_v3 }
 0x43f   :  { %v461_v12 = vmul.f32 %v841_v63, %v460_v2  ;;  %v807_v17 = vunpack.i.l.bf16 %v806_v13  ;;  %v808_v23 = vunpack.i.h.bf16 %v806_v13  ;;  %vm482_vm12 = vcmp.eq.f32.partialorder %v481_v27, 8.507059e+37 }
 0x440   :  { %v475_v31 = vmul.f32 %v843_v4, %v474_v19 }
 0x441   :  { %v462_v20 = vadd.f32 %v841_v63, %v461_v12 }
 0x442   :  { %v476_v35 = vadd.f32 %v843_v4, %v475_v31 }
 0x443   :  { %v466_v32 = vsel %vm465_vm7, %v841_v63, %v462_v20 }
 0x444   :  { %v471_v34 = vsel %vm468_vm8, %v470_v33, %v466_v32  ;;  %v480_v40 = vsel %vm479_vm11, %v843_v4, %v476_v35 }
 0x445   :  { %v531_v38 = vmul.f32 %v1133_v36, %v471_v34  ;;  %v485_v43 = vsel %vm482_vm12, %v484_v41, %v480_v40 }
 0x446   :  { %v532_v45 = vmul.f32 %v1120_v10, %v485_v43 }
 0x44b   :  { %v801_v7 = vpop.permute.xlu1 %800 }
 0x44c   :  { %v802_v9 = vunpack.i.l.bf16 %v801_v7  ;;  %v803_v16 = vunpack.i.h.bf16 %v801_v7  ;;  %v509_v7 = vand.u32 2147483647, %v412_v51 }
 0x44e   :  { %596 = vmatpush.msra.mxu0 %v802_v9  ;;  %771 = vmatpush.msra.mxu3 %v802_v9  ;;  %vm510_vm8 = vcmp.eq.f32.partialorder %v509_v7, 8.507059e+37  ;;  %v813_v7 = vld [vmem:[#allocation7 + $0xb0] ss:$0 sm:$0xff] }
 0x450   :  { %597 = vmatpush.msra.mxu0 %v803_v16  ;;  %772 = vmatpush.msra.mxu3 %v803_v16 }
 0x452   :  { %598 = vmatpush.msra.mxu0 %v807_v17  ;;  %773 = vmatpush.msra.mxu3 %v807_v17 }
 0x454   :  { %599 = vmatpush.msra.mxu0 %v808_v23  ;;  %774 = vmatpush.msra.mxu3 %v808_v23 }
 0x455   :  { %751 = vmatmul.msk.f32.vlgmr.msra.gmra.mxu3 %vm343_vm14, %v530_v26 }
 0x45d   :  { %752 = vmatmul.msk.f32.gmra.mxu3 %vm343_vm14, %v531_v38 }
 0x465   :  { %753 = vmatmul.msk.f32.gmra.mxu3 %vm343_vm14, %v532_v45 }
 0x469   :  { %v346_v46 = vpop.xlane.xlu0 %345 }
 0x46a   :  { %v368_v47 = vsub.f32 %v1145_v50, %v346_v46 }
 0x46c   :  { %v376_v48 = vmul.f32 1.442695, %v368_v47 }
 0x46e   :  { %844 = vpow2.f32 %v376_v48 }
 0x46f   :  { %846 = vrcp.f32 %v412_v51 }
 0x471   :  { %v415_v28 = vpop.xlane.xlu0 %414 }
 0x472   :  { %v525_v14 = vand.u32 2147483648, %v415_v28  ;;  %vm519_vm10 = vweird.f32 %v415_v28  ;;  %v523_v16 = vand.u32 2147483647, %v415_v28 }
 0x474   :  { %v1176_v36 = vpop.eup %844  ;;  %v526_v17 = vor.u32 1.1754944e-38, %v525_v14  ;;  %vm524_vm12 = vcmp.eq.f32.partialorder %v523_v16, 8.507059e+37 }
 0x475   :  { %v392_v52 = vsel %vm343_vm14, %v1176_v36, 0.0  ;;  %v847_v22 = vpop.eup %846 }
 0x476   :  { %v409_v39 = vpop.xlane.xlu1 %408  ;;  %393 = vadd.xlane.f32.xlu1 %v392_v52  ;;  %v501_v10 = vmul.f32 %v847_v22, %v412_v51  ;;  %vm506_vm3 = vweird.f32 %v847_v22 }
 0x477   :  { %848 = vrcp.f32 %v409_v39  ;;  %v497_v58 = vand.u32 2147483648, %v409_v39  ;;  %v495_v61 = vand.u32 2147483647, %v409_v39  ;;  %vm491_vm1 = vweird.f32 %v409_v39  ;;  %vm507_vm7 = vmor %vm505_vm6, %vm506_vm3 }
 0x478   :  { %850 = vrcp.f32 %v415_v28  ;;  %v502_v53 = vsub.f32 1.0, %v501_v10 }
 0x479   :  { %v498_v63 = vor.u32 1.1754944e-38, %v497_v58  ;;  %vm496_vm4 = vcmp.eq.f32.partialorder %v495_v61, 8.507059e+37 }
 0x47a   :  { %v503_v57 = vmul.f32 %v847_v22, %v502_v53 }
 0x47c   :  { %v504_v2 = vadd.f32 %v847_v22, %v503_v57 }
 0x47d   :  { %v849_v49 = vpop.eup %848 }
 0x47e   :  { %v487_v54 = vmul.f32 %v849_v49, %v409_v39  ;;  %v851_v50 = vpop.eup %850  ;;  %vm492_vm15 = vweird.f32 %v849_v49  ;;  %v508_v9 = vsel %vm507_vm7, %v847_v22, %v504_v2 }
 0x47f   :  { %v515_v59 = vmul.f32 %v851_v50, %v415_v28  ;;  %vm493_vm2 = vmor %vm491_vm1, %vm492_vm15  ;;  %v513_v12 = vsel %vm510_vm8, %v512_v11, %v508_v9  ;;  %vm520_vm9 = vweird.f32 %v851_v50 }
 0x480   :  { %v488_v55 = vsub.f32 1.0, %v487_v54  ;;  %v534_v15 = vmul.f32 %v1125_v25, %v513_v12  ;;  %vm521_vm11 = vmor %vm519_vm10, %vm520_vm9  ;;  %v83_v54 = vld [vmem:[#allocation7 + $0xa0] sm:$0xff]  ;;  %vm653_vm9 = vcmask 195584  }
 0x481   :  { %v516_v0 = vsub.f32 1.0, %v515_v59 }
 0x482   :  { %v489_v60 = vmul.f32 %v849_v49, %v488_v55  ;;  %v81_v55 = vld [vmem:[#allocation7 + $0x90] sm:$0xff] }
 0x483   :  { %v517_v8 = vmul.f32 %v851_v50, %v516_v0 }
 0x484   :  { %v490_v62 = vadd.f32 %v849_v49, %v489_v60 }
 0x485   :  { %v518_v13 = vadd.f32 %v851_v50, %v517_v8 }
 0x486   :  { %v494_v1 = vsel %vm493_vm2, %v849_v49, %v490_v62 }
 0x487   :  { %v499_v4 = vsel %vm496_vm4, %v498_v63, %v494_v1 }
 0x488   :  { %v533_v5 = vmul.f32 %v1154_v30, %v499_v4  ;;  %v522_v30 = vsel %vm521_vm11, %v851_v50, %v518_v13  ;;  %v82_v50 = vld [vmem:[#allocation7 + $0x98] sm:$0xff] }
 0x489   :  { %v527_v18 = vsel %vm524_vm12, %v526_v17, %v522_v30  ;;  %v856_v17 = vld [vmem:[#allocation2] sm:$0xff] }
 0x48a   :  { %754 = vmatmul.msk.f32.gmra.mxu3 %vm343_vm14, %v533_v5  ;;  %v535_v19 = vmul.f32 %v1150_v24, %v527_v18 }
 0x492   :  { %755 = vmatmul.msk.f32.gmra.mxu3 %vm343_vm14, %v534_v15 }
 0x49a   :  { %756 = vmatmul.msk.f32.gmra.mxu3 %vm343_vm14, %v535_v19 }
 0x4a2   :  { %v397_v23 = vpop.xlane.xlu2 %396 }
 0x4a3   :  { %852 = vrcp.f32 %v397_v23  ;;  %v441_v46 = vand.u32 2147483648, %v397_v23  ;;  %vm435_vm6 = vweird.f32 %v397_v23  ;;  %v439_v51 = vand.u32 2147483647, %v397_v23 }
 0x4a5   :  { %v442_v22 = vor.u32 1.1754944e-38, %v441_v46  ;;  %vm440_vm8 = vcmp.eq.f32.partialorder %v439_v51, 8.507059e+37 }
 0x4a9   :  { %v853_v29 = vpop.eup %852 }
 0x4aa   :  { %v431_v31 = vmul.f32 %v853_v29, %v397_v23  ;;  %vm436_vm4 = vweird.f32 %v853_v29 }
 0x4ab   :  { %vm437_vm7 = vmor %vm435_vm6, %vm436_vm4 }
 0x4ac   :  { %v432_v24 = vsub.f32 1.0, %v431_v31 }
 0x4ae   :  { %v433_v37 = vmul.f32 %v853_v29, %v432_v24 }
 0x4b0   :  { %v434_v45 = vadd.f32 %v853_v29, %v433_v37 }
 0x4b2   :  { %v438_v52 = vsel %vm437_vm7, %v853_v29, %v434_v45 }
 0x4b3   :  { %v443_v28 = vsel %vm440_vm8, %v442_v22, %v438_v52 }
 0x4b4   :  { %v529_v39 = vmul.f32 %v1160_v56, %v443_v28 }
 0x4d8   :  { %v607_v20 = vpop.f32.mrf.mxu3 }
 0x4d9   :  { %627 = vrot.lane.b32.xlu0 %v607_v20, %s962_s23 }
 0x4e0   :  { %v610_v21 = vpop.f32.mrf.mxu3 }
 0x4e1   :  { %629 = vrot.lane.b32.xlu0 %v610_v21, %s962_s23 }
 0x4e8   :  { %v613_v25 = vpop.f32.mrf.mxu3 }
 0x4e9   :  { %635 = vrot.lane.b32.xlu1 %v613_v25, %s970_s4  ;;  %v394_v26 = vpop.xlane.xlu1 %393 }
 0x4ea   :  { %854 = vrcp.f32 %v394_v26  ;;  %v427_v35 = vand.u32 2147483648, %v394_v26  ;;  %v425_v27 = vand.u32 2147483647, %v394_v26  ;;  %vm421_vm1 = vweird.f32 %v394_v26 }
 0x4ec   :  { %v428_v41 = vor.u32 1.1754944e-38, %v427_v35  ;;  %vm426_vm3 = vcmp.eq.f32.partialorder %v425_v27, 8.507059e+37 }
 0x4f0   :  { %v855_v32 = vpop.eup %854 }
 0x4f1   :  { %v417_v33 = vmul.f32 %v855_v32, %v394_v26  ;;  %vm422_vm15 = vweird.f32 %v855_v32 }
 0x4f2   :  { %vm423_vm2 = vmor %vm421_vm1, %vm422_vm15 }
 0x4f3   :  { %v418_v34 = vsub.f32 1.0, %v417_v33 }
 0x4f5   :  { %v419_v38 = vmul.f32 %v855_v32, %v418_v34 }
 0x4f7   :  { %v420_v40 = vadd.f32 %v855_v32, %v419_v38 }
 0x4f9   :  { %v424_v43 = vsel %vm423_vm2, %v855_v32, %v420_v40 }
 0x4fa   :  { %v429_v47 = vsel %vm426_vm3, %v428_v41, %v424_v43 }
 0x4fb   :  { %v528_v48 = vmul.f32 %v1176_v36, %v429_v47  ;;  %v84_v36 = vld [vmem:[#allocation7 + $0xa8] sm:$0xff] }
 0x4fc   :  { %675 = vmatpush.msrb.mxu0 %v84_v36 }
 0x4fd   :  { %749 = vmatmul.msk.f32.vlgmr.msra.gmra.mxu0 %vm343_vm14, %v528_v48 }
 0x4fe   :  { %676 = vmatpush.msrb.mxu0 %v83_v54 }
 0x500   :  { %677 = vmatpush.msrb.mxu0 %v82_v50 }
 0x502   :  { %678 = vmatpush.msrb.mxu0 %v81_v55 }
 0x505   :  { %750 = vmatmul.msk.f32.gmra.mxu0 %vm343_vm14, %v529_v39 }
 0x50d   :  { %v616_v10 = vpop.f32.mrf.mxu3 }
 0x50e   :  { %637 = vrot.lane.b32.xlu1 %v616_v10, %s970_s4 }
 0x515   :  { %v619_v49 = vpop.f32.mrf.mxu3 }
 0x516   :  { %643 = vrot.lane.b32.xlu2 %v619_v49, %s971_s5 }
 0x51d   :  { %v622_v53 = vpop.f32.mrf.mxu3 }
 0x51e   :  { %645 = vrot.lane.b32.xlu0 %v622_v53, %s971_s5 }
 0x54b   :  { %v628_v57 = vpop.permute.xlu0 %627 }
 0x553   :  { %v630_v63 = vpop.permute.xlu0 %629 }
 0x55b   :  { %v636_v58 = vpop.permute.xlu1 %635 }
 0x570   :  { %v644_v60 = vpop.permute.xlu2 %643 }
 0x57a   :  { %v601_v56 = vpop.f32.mrf.mxu0 }
 0x57b   :  { %v649_v59 = vsel %vm269_vm13, %v601_v56, %v628_v57 }
 0x57c   :  { %v651_v61 = vsel %vm109_vm5, %v649_v59, %v636_v58 }
 0x57d   :  { %v654_v62 = vsel %vm653_vm9, %v651_v61, %v644_v60 }
 0x57e   :  { %757 = vmatmul.msk.f32.vlgmr.msrb.gmra.mxu0 %vm139_vm0, %v654_v62 }
 0x580   :  { %v638_v2 = vpop.permute.xlu1 %637 }
 0x582   :  { %v604_v0 = vpop.f32.mrf.mxu0 }
 0x583   :  { %v650_v1 = vsel %vm269_vm13, %v604_v0, %v630_v63 }
 0x584   :  { %v652_v4 = vsel %vm109_vm5, %v650_v1, %v638_v2 }
 0x590   :  { %v646_v3 = vpop.permute.xlu0 %645 }
 0x591   :  { %v655_v5 = vsel %vm653_vm9, %v652_v4, %v646_v3 }
 0x592   :  { %758 = vmatmul.msk.f32.gmra.mxu0 %vm139_vm0, %v655_v5 }
 0x5fb   :  { %v680_v8 = vpop.f32.mrf.mxu0 }
 0x5fc   :  { %v681_v9 = vadd.f32 %v813_v7, %v680_v8 }
 0x5fe   :  { %688 = vrot.lane.b32.xlu2 %v681_v9, %s969_s30 }
 0x60f   :  { %v683_v11 = vpop.f32.mrf.mxu0 }
 0x610   :  { %v684_v12 = vadd.f32 %v813_v7, %v683_v11 }
 0x612   :  { %690 = vrot.lane.b32.xlu1 %v684_v12, %s969_s30 }
 0x658   :  { %v689_v13 = vpop.permute.xlu2 %688 }
 0x659   :  { %v694_v14 = vmul.f32 %v689_v13, %v1018_v42 }
 0x65b   :  { %698 = vrot.lane.b32.xlu0 %v694_v14, %s969_s30 }
 0x684   :  { %v691_v15 = vpop.permute.xlu1 %690 }
 0x685   :  { %v695_v16 = vmul.f32 %v691_v15, %v1022_v44 }
 0x687   :  { %700 = vrot.lane.b32.xlu2 %v695_v16, %s969_s30 }
 0x6cd   :  { %v699_v30 = vpop.permute.xlu0 %698 }
 0x6ce   :  { %v704_v18 = vadd.f32 %v856_v17, %v699_v30 }
 0x6d0   :  { %706 = vst.msk [vmem:[#allocation8] sm:$0xff] %vm139_vm0, %v704_v18 }
 0x6e1   :  { %v701_v19 = vpop.permute.xlu2 %700 }
 0x6e2   :  { %v705_v42 = vadd.f32 %v701_v19, %v1009_v6 }
 0x6e4   :  { %707 = vst.msk [vmem:[#allocation8 + $0x8] sm:$0xff] %vm139_vm0, %v705_v42 }
 0x6e5   :  { %720 = dma.vmem_to_hbm [thread:$0]  %s713_s7, 256, %s715_s10, [#allocation4], %s961_s22, %s961_s22, %s962_s23  }
 0x6e6   :  { %957 = dma.done.wait [#allocation4], 256  }
 0x6e7   :  { %958 = vsyncadd [#allocation4], 4294967040 }
 0x6e8   :  { %725 = vsyncpa [#allocation3], 1 }
 0x6e9   :  { %726 = vsyncpa [#allocation6], 1 }
 0x6ea   :  { %727 = vsyncpa [#allocation4], 1 }

</bundles_post_ra>
